<compile_context>
chip_gen: v7x
topology: tpu7x:2x2x1
jax: 0.10.0
libtpu: 0.0.40
codegen_flags: <defaults>
</compile_context>

<pallas_src>
import jax
import jax.numpy as jnp
from jax.experimental import pallas as pl
from jax.experimental.pallas import tpu as pltpu

BATCH = 2
SEQ_LEN = 8
INPUT_SIZE = 4
HIDDEN_SIZE = 10
NUM_LAYERS = 2  # hard-wired: two stacked RNN layers below


def _rnn_kernel(
    x_ref,     # (T, B, I)   time-major input, fully resident in VMEM
    w0_ref,    # (I+H, H)    concat([W_ih0, W_hh0], axis=1).T  (pre-transposed)
    b0_ref,    # (1, H)      b_ih0 + b_hh0
    w1_ref,    # (2H, H)     concat([W_ih1, W_hh1], axis=1).T
    b1_ref,    # (1, H)      b_ih1 + b_hh1
    wfc_ref,   # (T*H, 1)    fc weight, pre-transposed
    bfc_ref,   # (1, 1)
    y_ref,     # (B, 1)
):
    T, B, _ = x_ref.shape
    H = b0_ref.shape[1]

    w0 = w0_ref[...]
    b0 = b0_ref[...]
    w1 = w1_ref[...]
    b1 = b1_ref[...]

    h1 = jnp.zeros((B, H), jnp.float32)
    h2 = jnp.zeros((B, H), jnp.float32)
    outs = []
    # T is tiny and static: fully unrolled recurrence, hidden states stay in vregs.
    for t in range(T):
        x_t = x_ref[t]                                      # (B, I)
        # layer 0: tanh([x_t, h1] @ W0 + b0)  ==  tanh(x W_ih0^T + h1 W_hh0^T + b_ih0 + b_hh0)
        h1 = jnp.tanh(
            jnp.dot(jnp.concatenate([x_t, h1], axis=-1), w0,
                    preferred_element_type=jnp.float32) + b0)
        # layer 1: tanh([h1, h2] @ W1 + b1)
        h2 = jnp.tanh(
            jnp.dot(jnp.concatenate([h1, h2], axis=-1), w1,
                    preferred_element_type=jnp.float32) + b1)
        outs.append(h2)

    # (B, T*H) flattened exactly like PyTorch's out.reshape(B, -1) (t-major, then h)
    out_flat = jnp.concatenate(outs, axis=-1)
    y_ref[...] = jax.nn.sigmoid(
        jnp.dot(out_flat, wfc_ref[...], preferred_element_type=jnp.float32)
        + bfc_ref[...])


@jax.jit
def vanilla_rnn_forward(x, params):
    """x: (B, T, I) float32 (batch_first, like PyTorch). Returns (B, 1)."""
    B, T, I = x.shape
    H = HIDDEN_SIZE

    # All layout/fusion prep done once in XLA, outside the kernel:
    x_tm = jnp.transpose(x, (1, 0, 2))                                  # (T, B, I)
    w0 = jnp.concatenate([params["w_ih0"], params["w_hh0"]], axis=1).T  # (I+H, H)
    b0 = (params["b_ih0"] + params["b_hh0"])[None, :]                   # (1, H)
    w1 = jnp.concatenate([params["w_ih1"], params["w_hh1"]], axis=1).T  # (2H, H)
    b1 = (params["b_ih1"] + params["b_hh1"])[None, :]                   # (1, H)
    wfc = params["w_fc"].T                                              # (T*H, 1)
    bfc = params["b_fc"].reshape(1, 1)                                  # (1, 1)

    vmem = pl.BlockSpec(memory_space=pltpu.MemorySpace.VMEM)
    y = pl.pallas_call(
        _rnn_kernel,
        out_shape=jax.ShapeDtypeStruct((B, 1), jnp.float32),
        in_specs=[vmem] * 7,
        out_specs=vmem,
    )(x_tm, w0, b0, w1, b1, wfc, bfc)
    return y


def init_params(key, input_size, hidden_size, seq_len):
    """PyTorch-style uniform(-1/sqrt(fan), 1/sqrt(fan)) init, deterministic."""
    H, I, T = hidden_size, input_size, seq_len
    ks = jax.random.split(key, 10)
    s_rnn = 1.0 / jnp.sqrt(jnp.float32(H))
    s_fc = 1.0 / jnp.sqrt(jnp.float32(H * T))
    u = lambda k, shape, s: jax.random.uniform(k, shape, jnp.float32, -s, s)
    return {
        "w_ih0": u(ks[0], (H, I), s_rnn),
        "w_hh0": u(ks[1], (H, H), s_rnn),
        "b_ih0": u(ks[2], (H,), s_rnn),
        "b_hh0": u(ks[3], (H,), s_rnn),
        "w_ih1": u(ks[4], (H, H), s_rnn),
        "w_hh1": u(ks[5], (H, H), s_rnn),
        "b_ih1": u(ks[6], (H,), s_rnn),
        "b_hh1": u(ks[7], (H,), s_rnn),
        "w_fc": u(ks[8], (1, H * T), s_fc),
        "b_fc": u(ks[9], (1,), s_fc),
    }


def reference_forward(x, params):
    """Pure-JAX reference mirroring the PyTorch forward pass."""
    B, T, _ = x.shape
    H = HIDDEN_SIZE
    h1 = jnp.zeros((B, H), jnp.float32)
    h2 = jnp.zeros((B, H), jnp.float32)
    outs = []
    for t in range(T):
        h1 = jnp.tanh(x[:, t] @ params["w_ih0"].T + params["b_ih0"]
                      + h1 @ params["w_hh0"].T + params["b_hh0"])
        h2 = jnp.tanh(h1 @ params["w_ih1"].T + params["b_ih1"]
                      + h2 @ params["w_hh1"].T + params["b_hh1"])
        outs.append(h2)
    out = jnp.stack(outs, axis=1).reshape(B, -1)          # (B, T*H)
    return jax.nn.sigmoid(out @ params["w_fc"].T + params["b_fc"])


if __name__ == "__main__":
    key = jax.random.PRNGKey(0)
    k_param, k_x = jax.random.split(key)
    params = init_params(k_param, INPUT_SIZE, HIDDEN_SIZE, SEQ_LEN)
    x = jax.random.normal(k_x, (BATCH, SEQ_LEN, INPUT_SIZE), jnp.float32)

    y = vanilla_rnn_forward(x, params)
    y = jax.block_until_ready(y)

    y_ref = reference_forward(x, params)
    assert y.shape == (BATCH, 1), y.shape
    assert jnp.allclose(y, y_ref, atol=1e-5, rtol=1e-5), (y, y_ref)
    print("KERNEL_OK")
</pallas_src>

<mosaic_0001>
module attributes {stable_mosaic.version = 11 : i64} {
  func.func @_rnn_kernel(%arg0: memref<8x2x4xf32, #tpu.memory_space<vmem>>, %arg1: memref<14x10xf32, #tpu.memory_space<vmem>>, %arg2: memref<1x10xf32, #tpu.memory_space<vmem>>, %arg3: memref<20x10xf32, #tpu.memory_space<vmem>>, %arg4: memref<1x10xf32, #tpu.memory_space<vmem>>, %arg5: memref<80x1xf32, #tpu.memory_space<vmem>>, %arg6: memref<1x1xf32, #tpu.memory_space<vmem>>, %arg7: memref<2x1xf32, #tpu.memory_space<vmem>>) attributes {dimension_semantics = [], scalar_prefetch = 0 : i64, scratch_operands = 0 : i64, tpu.core_type = #tpu.core_type<tc>} {
    %c0 = arith.constant 0 : index
    %c0_0 = arith.constant 0 : index
    %0 = vector.load %arg1[%c0, %c0_0] : memref<14x10xf32, #tpu.memory_space<vmem>>, vector<14x10xf32>
    %c0_1 = arith.constant 0 : index
    %c0_2 = arith.constant 0 : index
    %1 = vector.load %arg2[%c0_1, %c0_2] : memref<1x10xf32, #tpu.memory_space<vmem>>, vector<1x10xf32>
    %c0_3 = arith.constant 0 : index
    %c0_4 = arith.constant 0 : index
    %2 = vector.load %arg3[%c0_3, %c0_4] : memref<20x10xf32, #tpu.memory_space<vmem>>, vector<20x10xf32>
    %c0_5 = arith.constant 0 : index
    %c0_6 = arith.constant 0 : index
    %3 = vector.load %arg4[%c0_5, %c0_6] : memref<1x10xf32, #tpu.memory_space<vmem>>, vector<1x10xf32>
    %cst = arith.constant 0.000000e+00 : f32
    %4 = vector.broadcast %cst : f32 to vector<2x10xf32>
    %cst_7 = arith.constant 0.000000e+00 : f32
    %5 = vector.broadcast %cst_7 : f32 to vector<2x10xf32>
    %c0_8 = arith.constant 0 : index
    %c0_9 = arith.constant 0 : index
    %c0_10 = arith.constant 0 : index
    %6 = vector.load %arg0[%c0_8, %c0_9, %c0_10] : memref<8x2x4xf32, #tpu.memory_space<vmem>>, vector<1x2x4xf32>
    %7 = vector.shape_cast %6 : vector<1x2x4xf32> to vector<2x4xf32>
    %8 = tpu.concatenate %7, %4 in 1 : vector<2x4xf32>, vector<2x10xf32> -> vector<2x14xf32>
    %cst_11 = arith.constant dense<0.000000e+00> : vector<2x10xf32>
    %9 = tpu.matmul %8, %0, %cst_11 {dimension_numbers = #tpu.dot_dimension_numbers<[1], [0], [0], [1], [0, 0, 1, 1], [], []>} : vector<2x14xf32>, vector<14x10xf32>, vector<2x10xf32> -> vector<2x10xf32>
    %10 = vector.broadcast %1 : vector<1x10xf32> to vector<2x10xf32>
    %11 = arith.addf %9, %10 : vector<2x10xf32>
    %12 = math.tanh %11 : vector<2x10xf32>
    %13 = tpu.concatenate %12, %5 in 1 : vector<2x10xf32>, vector<2x10xf32> -> vector<2x20xf32>
    %cst_12 = arith.constant dense<0.000000e+00> : vector<2x10xf32>
    %14 = tpu.matmul %13, %2, %cst_12 {dimension_numbers = #tpu.dot_dimension_numbers<[1], [0], [0], [1], [0, 0, 1, 1], [], []>} : vector<2x20xf32>, vector<20x10xf32>, vector<2x10xf32> -> vector<2x10xf32>
    %15 = vector.broadcast %3 : vector<1x10xf32> to vector<2x10xf32>
    %16 = arith.addf %14, %15 : vector<2x10xf32>
    %17 = math.tanh %16 : vector<2x10xf32>
    %c1 = arith.constant 1 : index
    %c0_13 = arith.constant 0 : index
    %c0_14 = arith.constant 0 : index
    %18 = vector.load %arg0[%c1, %c0_13, %c0_14] : memref<8x2x4xf32, #tpu.memory_space<vmem>>, vector<1x2x4xf32>
    %19 = vector.shape_cast %18 : vector<1x2x4xf32> to vector<2x4xf32>
    %20 = tpu.concatenate %19, %12 in 1 : vector<2x4xf32>, vector<2x10xf32> -> vector<2x14xf32>
    %cst_15 = arith.constant dense<0.000000e+00> : vector<2x10xf32>
    %21 = tpu.matmul %20, %0, %cst_15 {dimension_numbers = #tpu.dot_dimension_numbers<[1], [0], [0], [1], [0, 0, 1, 1], [], []>} : vector<2x14xf32>, vector<14x10xf32>, vector<2x10xf32> -> vector<2x10xf32>
    %22 = vector.broadcast %1 : vector<1x10xf32> to vector<2x10xf32>
    %23 = arith.addf %21, %22 : vector<2x10xf32>
    %24 = math.tanh %23 : vector<2x10xf32>
    %25 = tpu.concatenate %24, %17 in 1 : vector<2x10xf32>, vector<2x10xf32> -> vector<2x20xf32>
    %cst_16 = arith.constant dense<0.000000e+00> : vector<2x10xf32>
    %26 = tpu.matmul %25, %2, %cst_16 {dimension_numbers = #tpu.dot_dimension_numbers<[1], [0], [0], [1], [0, 0, 1, 1], [], []>} : vector<2x20xf32>, vector<20x10xf32>, vector<2x10xf32> -> vector<2x10xf32>
    %27 = vector.broadcast %3 : vector<1x10xf32> to vector<2x10xf32>
    %28 = arith.addf %26, %27 : vector<2x10xf32>
    %29 = math.tanh %28 : vector<2x10xf32>
    %c2 = arith.constant 2 : index
    %c0_17 = arith.constant 0 : index
    %c0_18 = arith.constant 0 : index
    %30 = vector.load %arg0[%c2, %c0_17, %c0_18] : memref<8x2x4xf32, #tpu.memory_space<vmem>>, vector<1x2x4xf32>
    %31 = vector.shape_cast %30 : vector<1x2x4xf32> to vector<2x4xf32>
    %32 = tpu.concatenate %31, %24 in 1 : vector<2x4xf32>, vector<2x10xf32> -> vector<2x14xf32>
    %cst_19 = arith.constant dense<0.000000e+00> : vector<2x10xf32>
    %33 = tpu.matmul %32, %0, %cst_19 {dimension_numbers = #tpu.dot_dimension_numbers<[1], [0], [0], [1], [0, 0, 1, 1], [], []>} : vector<2x14xf32>, vector<14x10xf32>, vector<2x10xf32> -> vector<2x10xf32>
    %34 = vector.broadcast %1 : vector<1x10xf32> to vector<2x10xf32>
    %35 = arith.addf %33, %34 : vector<2x10xf32>
    %36 = math.tanh %35 : vector<2x10xf32>
    %37 = tpu.concatenate %36, %29 in 1 : vector<2x10xf32>, vector<2x10xf32> -> vector<2x20xf32>
    %cst_20 = arith.constant dense<0.000000e+00> : vector<2x10xf32>
    %38 = tpu.matmul %37, %2, %cst_20 {dimension_numbers = #tpu.dot_dimension_numbers<[1], [0], [0], [1], [0, 0, 1, 1], [], []>} : vector<2x20xf32>, vector<20x10xf32>, vector<2x10xf32> -> vector<2x10xf32>
    %39 = vector.broadcast %3 : vector<1x10xf32> to vector<2x10xf32>
    %40 = arith.addf %38, %39 : vector<2x10xf32>
    %41 = math.tanh %40 : vector<2x10xf32>
    %c3 = arith.constant 3 : index
    %c0_21 = arith.constant 0 : index
    %c0_22 = arith.constant 0 : index
    %42 = vector.load %arg0[%c3, %c0_21, %c0_22] : memref<8x2x4xf32, #tpu.memory_space<vmem>>, vector<1x2x4xf32>
    %43 = vector.shape_cast %42 : vector<1x2x4xf32> to vector<2x4xf32>
    %44 = tpu.concatenate %43, %36 in 1 : vector<2x4xf32>, vector<2x10xf32> -> vector<2x14xf32>
    %cst_23 = arith.constant dense<0.000000e+00> : vector<2x10xf32>
    %45 = tpu.matmul %44, %0, %cst_23 {dimension_numbers = #tpu.dot_dimension_numbers<[1], [0], [0], [1], [0, 0, 1, 1], [], []>} : vector<2x14xf32>, vector<14x10xf32>, vector<2x10xf32> -> vector<2x10xf32>
    %46 = vector.broadcast %1 : vector<1x10xf32> to vector<2x10xf32>
    %47 = arith.addf %45, %46 : vector<2x10xf32>
    %48 = math.tanh %47 : vector<2x10xf32>
    %49 = tpu.concatenate %48, %41 in 1 : vector<2x10xf32>, vector<2x10xf32> -> vector<2x20xf32>
    %cst_24 = arith.constant dense<0.000000e+00> : vector<2x10xf32>
    %50 = tpu.matmul %49, %2, %cst_24 {dimension_numbers = #tpu.dot_dimension_numbers<[1], [0], [0], [1], [0, 0, 1, 1], [], []>} : vector<2x20xf32>, vector<20x10xf32>, vector<2x10xf32> -> vector<2x10xf32>
    %51 = vector.broadcast %3 : vector<1x10xf32> to vector<2x10xf32>
    %52 = arith.addf %50, %51 : vector<2x10xf32>
    %53 = math.tanh %52 : vector<2x10xf32>
    %c4 = arith.constant 4 : index
    %c0_25 = arith.constant 0 : index
    %c0_26 = arith.constant 0 : index
    %54 = vector.load %arg0[%c4, %c0_25, %c0_26] : memref<8x2x4xf32, #tpu.memory_space<vmem>>, vector<1x2x4xf32>
    %55 = vector.shape_cast %54 : vector<1x2x4xf32> to vector<2x4xf32>
    %56 = tpu.concatenate %55, %48 in 1 : vector<2x4xf32>, vector<2x10xf32> -> vector<2x14xf32>
    %cst_27 = arith.constant dense<0.000000e+00> : vector<2x10xf32>
    %57 = tpu.matmul %56, %0, %cst_27 {dimension_numbers = #tpu.dot_dimension_numbers<[1], [0], [0], [1], [0, 0, 1, 1], [], []>} : vector<2x14xf32>, vector<14x10xf32>, vector<2x10xf32> -> vector<2x10xf32>
    %58 = vector.broadcast %1 : vector<1x10xf32> to vector<2x10xf32>
    %59 = arith.addf %57, %58 : vector<2x10xf32>
    %60 = math.tanh %59 : vector<2x10xf32>
    %61 = tpu.concatenate %60, %53 in 1 : vector<2x10xf32>, vector<2x10xf32> -> vector<2x20xf32>
    %cst_28 = arith.constant dense<0.000000e+00> : vector<2x10xf32>
    %62 = tpu.matmul %61, %2, %cst_28 {dimension_numbers = #tpu.dot_dimension_numbers<[1], [0], [0], [1], [0, 0, 1, 1], [], []>} : vector<2x20xf32>, vector<20x10xf32>, vector<2x10xf32> -> vector<2x10xf32>
    %63 = vector.broadcast %3 : vector<1x10xf32> to vector<2x10xf32>
    %64 = arith.addf %62, %63 : vector<2x10xf32>
    %65 = math.tanh %64 : vector<2x10xf32>
    %c5 = arith.constant 5 : index
    %c0_29 = arith.constant 0 : index
    %c0_30 = arith.constant 0 : index
    %66 = vector.load %arg0[%c5, %c0_29, %c0_30] : memref<8x2x4xf32, #tpu.memory_space<vmem>>, vector<1x2x4xf32>
    %67 = vector.shape_cast %66 : vector<1x2x4xf32> to vector<2x4xf32>
    %68 = tpu.concatenate %67, %60 in 1 : vector<2x4xf32>, vector<2x10xf32> -> vector<2x14xf32>
    %cst_31 = arith.constant dense<0.000000e+00> : vector<2x10xf32>
    %69 = tpu.matmul %68, %0, %cst_31 {dimension_numbers = #tpu.dot_dimension_numbers<[1], [0], [0], [1], [0, 0, 1, 1], [], []>} : vector<2x14xf32>, vector<14x10xf32>, vector<2x10xf32> -> vector<2x10xf32>
    %70 = vector.broadcast %1 : vector<1x10xf32> to vector<2x10xf32>
    %71 = arith.addf %69, %70 : vector<2x10xf32>
    %72 = math.tanh %71 : vector<2x10xf32>
    %73 = tpu.concatenate %72, %65 in 1 : vector<2x10xf32>, vector<2x10xf32> -> vector<2x20xf32>
    %cst_32 = arith.constant dense<0.000000e+00> : vector<2x10xf32>
    %74 = tpu.matmul %73, %2, %cst_32 {dimension_numbers = #tpu.dot_dimension_numbers<[1], [0], [0], [1], [0, 0, 1, 1], [], []>} : vector<2x20xf32>, vector<20x10xf32>, vector<2x10xf32> -> vector<2x10xf32>
    %75 = vector.broadcast %3 : vector<1x10xf32> to vector<2x10xf32>
    %76 = arith.addf %74, %75 : vector<2x10xf32>
    %77 = math.tanh %76 : vector<2x10xf32>
    %c6 = arith.constant 6 : index
    %c0_33 = arith.constant 0 : index
    %c0_34 = arith.constant 0 : index
    %78 = vector.load %arg0[%c6, %c0_33, %c0_34] : memref<8x2x4xf32, #tpu.memory_space<vmem>>, vector<1x2x4xf32>
    %79 = vector.shape_cast %78 : vector<1x2x4xf32> to vector<2x4xf32>
    %80 = tpu.concatenate %79, %72 in 1 : vector<2x4xf32>, vector<2x10xf32> -> vector<2x14xf32>
    %cst_35 = arith.constant dense<0.000000e+00> : vector<2x10xf32>
    %81 = tpu.matmul %80, %0, %cst_35 {dimension_numbers = #tpu.dot_dimension_numbers<[1], [0], [0], [1], [0, 0, 1, 1], [], []>} : vector<2x14xf32>, vector<14x10xf32>, vector<2x10xf32> -> vector<2x10xf32>
    %82 = vector.broadcast %1 : vector<1x10xf32> to vector<2x10xf32>
    %83 = arith.addf %81, %82 : vector<2x10xf32>
    %84 = math.tanh %83 : vector<2x10xf32>
    %85 = tpu.concatenate %84, %77 in 1 : vector<2x10xf32>, vector<2x10xf32> -> vector<2x20xf32>
    %cst_36 = arith.constant dense<0.000000e+00> : vector<2x10xf32>
    %86 = tpu.matmul %85, %2, %cst_36 {dimension_numbers = #tpu.dot_dimension_numbers<[1], [0], [0], [1], [0, 0, 1, 1], [], []>} : vector<2x20xf32>, vector<20x10xf32>, vector<2x10xf32> -> vector<2x10xf32>
    %87 = vector.broadcast %3 : vector<1x10xf32> to vector<2x10xf32>
    %88 = arith.addf %86, %87 : vector<2x10xf32>
    %89 = math.tanh %88 : vector<2x10xf32>
    %c7 = arith.constant 7 : index
    %c0_37 = arith.constant 0 : index
    %c0_38 = arith.constant 0 : index
    %90 = vector.load %arg0[%c7, %c0_37, %c0_38] : memref<8x2x4xf32, #tpu.memory_space<vmem>>, vector<1x2x4xf32>
    %91 = vector.shape_cast %90 : vector<1x2x4xf32> to vector<2x4xf32>
    %92 = tpu.concatenate %91, %84 in 1 : vector<2x4xf32>, vector<2x10xf32> -> vector<2x14xf32>
    %cst_39 = arith.constant dense<0.000000e+00> : vector<2x10xf32>
    %93 = tpu.matmul %92, %0, %cst_39 {dimension_numbers = #tpu.dot_dimension_numbers<[1], [0], [0], [1], [0, 0, 1, 1], [], []>} : vector<2x14xf32>, vector<14x10xf32>, vector<2x10xf32> -> vector<2x10xf32>
    %94 = vector.broadcast %1 : vector<1x10xf32> to vector<2x10xf32>
    %95 = arith.addf %93, %94 : vector<2x10xf32>
    %96 = math.tanh %95 : vector<2x10xf32>
    %97 = tpu.concatenate %96, %89 in 1 : vector<2x10xf32>, vector<2x10xf32> -> vector<2x20xf32>
    %cst_40 = arith.constant dense<0.000000e+00> : vector<2x10xf32>
    %98 = tpu.matmul %97, %2, %cst_40 {dimension_numbers = #tpu.dot_dimension_numbers<[1], [0], [0], [1], [0, 0, 1, 1], [], []>} : vector<2x20xf32>, vector<20x10xf32>, vector<2x10xf32> -> vector<2x10xf32>
    %99 = vector.broadcast %3 : vector<1x10xf32> to vector<2x10xf32>
    %100 = arith.addf %98, %99 : vector<2x10xf32>
    %101 = math.tanh %100 : vector<2x10xf32>
    %102 = tpu.concatenate %17, %29, %41, %53, %65, %77, %89, %101 in 1 : vector<2x10xf32>, vector<2x10xf32>, vector<2x10xf32>, vector<2x10xf32>, vector<2x10xf32>, vector<2x10xf32>, vector<2x10xf32>, vector<2x10xf32> -> vector<2x80xf32>
    %c0_41 = arith.constant 0 : index
    %c0_42 = arith.constant 0 : index
    %103 = vector.load %arg5[%c0_41, %c0_42] : memref<80x1xf32, #tpu.memory_space<vmem>>, vector<80x1xf32>
    %cst_43 = arith.constant dense<0.000000e+00> : vector<2x1xf32>
    %104 = tpu.matmul %102, %103, %cst_43 {dimension_numbers = #tpu.dot_dimension_numbers<[1], [0], [0], [1], [0, 0, 1, 1], [], []>} : vector<2x80xf32>, vector<80x1xf32>, vector<2x1xf32> -> vector<2x1xf32>
    %c0_44 = arith.constant 0 : index
    %c0_45 = arith.constant 0 : index
    %105 = vector.load %arg6[%c0_44, %c0_45] : memref<1x1xf32, #tpu.memory_space<vmem>>, vector<1x1xf32>
    %106 = vector.broadcast %105 : vector<1x1xf32> to vector<2x1xf32>
    %107 = arith.addf %104, %106 : vector<2x1xf32>
    %108 = arith.negf %107 : vector<2x1xf32>
    %109 = math.exp %108 : vector<2x1xf32>
    %cst_46 = arith.constant 1.000000e+00 : f32
    %110 = vector.broadcast %cst_46 : f32 to vector<2x1xf32>
    %111 = arith.addf %110, %109 : vector<2x1xf32>
    %112 = arith.divf %110, %111 : vector<2x1xf32>
    %c0_47 = arith.constant 0 : index
    %c0_48 = arith.constant 0 : index
    %113 = vector.load %arg7[%c0_47, %c0_48] : memref<2x1xf32, #tpu.memory_space<vmem>>, vector<2x1xf32>
    tpu.vector_store %arg7[%c0_47, %c0_48], %112 {strides = array<i32>} : memref<2x1xf32, #tpu.memory_space<vmem>>, vector<2x1xf32>,
    return
  }
}

</mosaic_0001>

<bundles_post_ra>
// kernel: vanilla_rnn_forward.1
= control target key start
LH: loop header
LB: loop body
LE: loop exit
PB: predicated region body
PF: predicated region fallthrough
CT: control target
= control target key end

     0   :  { %vm48_vm0 = vcmask 1045504   ;;  %v1845_v0 = vmov 0.0|0.0   ;;  %vm1846_vm1 = vmmov 1   ;;  %vm36_vm3 = vcmask 31744   ;;  %s1850_s17 = smov 10   ;;  %s1851_s27 = smov 20   ;;  %s2183_s1 = inlined_call_operand.vmem [shape: f32[14,10], index: 1, kind: input, shape index: {}]   ;;  %s2184_s0 = inlined_call_operand.vmem [shape: f32[8,2,4], index: 0, kind: input, shape index: {}]   ;;  %s2185_s3 = inlined_call_operand.vmem [shape: f32[20,10], index: 3, kind: input, shape index: {}]   ;;  %s2186_s2 = inlined_call_operand.vmem [shape: f32[1,10], index: 2, kind: input, shape index: {}]   ;;  %s2187_s4 = inlined_call_operand.vmem [shape: f32[1,10], index: 4, kind: input, shape index: {}]   ;;  %s2188_s5 = inlined_call_operand.vmem [shape: f32[80,1], index: 5, kind: input, shape index: {}]   ;;  %s2189_s6 = inlined_call_operand.<no memory space> [shape: f32[1,1], index: 6, kind: input, shape index: {}]   ;;  %s2190_s7 = inlined_call_operand.vmem [shape: f32[2,1], index: 7, kind: output, shape index: {}]  }
   0x1   :  { %1726 = vmatprep.subr.bf16.mxu0 %v1845_v0  ;;  %v28_v1 = vld [vmem:[%s2183_s1] sm:$0xff]  ;;  %v29_v2 = vld [vmem:[%s2183_s1 + $0x8] sm:$0x3f]  ;;  %vm1904_vm2 = vmpackc.low %vm48_vm0, %vm1846_vm1  ;;  %1730 = vmatprep.subr.bf16.mxu1 %v1845_v0  ;;  %vm1847_vm4 = vmmov 0   ;;  %v1848_v5 = vmov 0.0   ;;  %vm44_vm5 = vcmask 113664  }
   0x2   :  { %v1909_v4 = vpack.c.bf16 %v29_v2, %v28_v1  ;;  %1579 = vmatprep.mubr.msk.f32.mxu0 %vm1847_vm4, %v1848_v5  ;;  %v35_v6 = vld [vmem:[%s2184_s0] sm:$0x3]  ;;  %1588 = vmatprep.mubr.msk.f32.mxu1 %vm1847_vm4, %v1848_v5  ;;  %v32_v9 = vld [vmem:[%s2185_s3 + $0x8] sm:$0xff]  ;;  %v1943_v11 = vld [vmem:[%s2185_s3 + $0x10] sm:$0xf]  ;;  %vm135_vm6 = vcmask 1043456  }
   0x3   :  { %v37_v7 = vsel %vm36_vm3, %v35_v6, 0.0  ;;  %v31_v8 = vld [vmem:[%s2185_s3] sm:$0xff]  ;;  %vm123_vm7 = vcmask 80896   ;;  %vm131_vm8 = vcmask 162816   ;;  %s1849_s3 = smov 4   ;;  %s1852_s28 = smov 40  }
   0x4   :  { %1729 = vmatpush3.bf16.msk.msra.mxu0 %vm1904_vm2, %v1909_v4  ;;  %v1936_v10 = vpack.c.bf16 %v32_v9, %v31_v8  ;;  %v1951_v12 = vld [vmem:[%s2186_s2] ss:$0 sm:$0xff]  ;;  %v1470_v18 = vld [vmem:[%s2184_s0 + $0x2] sm:$0x3]  ;;  %v1475_v32 = vld [vmem:[%s2184_s0 + $0x4] sm:$0x3] }
   0x5   :  { %1733 = vmatprep.subr.bf16.mxu0 %v1845_v0  ;;  %v1978_v21 = vld [vmem:[%s2187_s4] ss:$0 sm:$0xff]  ;;  %v1480_v45 = vld [vmem:[%s2184_s0 + $0x6] sm:$0x3]  ;;  %v1485_v58 = vld [vmem:[%s2184_s0 + $0x8] sm:$0x3] }
   0x6   :  { %1732 = vmatpush3.bf16.msra.mxu1 %v1936_v10  ;;  %s1854_s30 = smov 30   ;;  %s1855_s8 = smov 50   ;;  %vm1351_vm9 = vcmask 244736   ;;  %vm1353_vm10 = vcmask 326656   ;;  %vm1355_vm11 = vcmask 408576   ;;  %vm1357_vm12 = vcmask 490496  }
   0x7   :  { %1580 = vmatmul.mubr.msk.f32.vlgmr.msra.gmra.mrb[0].mxu0 %vm44_vm5, %v37_v7  ;;  %1586 = vmatprep.subr.mxu1 %v1848_v5  ;;  %vm1359_vm13 = vcmask 572416   ;;  %vm1378_vm14 = vcmask 654336   ;;  %vm1458_vm15 = vcmask 1024  }
   0x8   :  { %1736 = vmatpush3.bf16.msk.msra.mxu0 %vm1904_vm2, %v1909_v4  ;;  %1595 = vmatprep.mubr.msk.f32.mxu0 %vm1847_vm4, %v1848_v5 }
   0x9   :  { %1740 = vmatprep.subr.bf16.mxu0 %v1845_v0 }
   0xa   :  { %1587 = vmatpush3.msk.msra.mxu1 %vm135_vm6, %v1943_v11 }
   0xb   :  { %1737 = vmatprep.subr.bf16.mxu1 %v1845_v0 }
  0xda   :  { %v118_v13 = vpop.f32.mrb[0].mxu0 }
  0xdb   :  { %v119_v14 = vadd.f32 %v1951_v12, %v118_v13  ;;  %v1581_v15 = vpop.f32.mrb[1].mxu0 }
  0xdd   :  { %1809 = vtanh.f32 %v119_v14  ;;  %v1490_v14 = vld [vmem:[%s2184_s0 + $0xa] sm:$0x3] }
  0xe7   :  { %v1810_v16 = vpop.eup %1809 }
  0xe8   :  { %213 = vrot.lane.b32.xlu0 %v1810_v16, %s1849_s3  ;;  %v124_v17 = vsel %vm123_vm7, %v1810_v16, 0.0 }
  0xe9   :  { %1589 = vmatmul.mubr.msk.f32.vlgmr.msra.gmra.mrb[0].mxu1 %vm131_vm8, %v124_v17 }
  0xea   :  { %1739 = vmatpush3.bf16.msra.mxu1 %v1936_v10  ;;  %1604 = vmatprep.mubr.msk.f32.mxu1 %vm1847_vm4, %v1848_v5 }
  0xeb   :  { %1602 = vmatprep.subr.mxu1 %v1848_v5 }
  0xee   :  { %1603 = vmatpush3.msk.msra.mxu1 %vm135_vm6, %v1943_v11 }
  0xef   :  { %1744 = vmatprep.subr.bf16.mxu1 %v1845_v0 }
 0x15a   :  { %v214_v19 = vpop.permute.xlu0 %213 }
 0x15b   :  { %v216_v20 = vsel %vm36_vm3, %v1470_v18, %v214_v19 }
 0x15c   :  { %1596 = vmatmul.mubr.msk.f32.vlgmr.msra.gmra.mrb[2].mxu0 %vm44_vm5, %v216_v20 }
 0x15d   :  { %1743 = vmatpush3.bf16.msk.msra.mxu0 %vm1904_vm2, %v1909_v4  ;;  %1611 = vmatprep.mubr.msk.f32.mxu0 %vm1847_vm4, %v1848_v5 }
 0x15e   :  { %1754 = vmatprep.subr.bf16.mxu0 %v1845_v0 }
 0x1bc   :  { %v205_v22 = vpop.f32.mrb[0].mxu1 }
 0x1bd   :  { %v206_v23 = vadd.f32 %v1978_v21, %v205_v22  ;;  %v1590_v24 = vpop.f32.mrb[1].mxu1 }
 0x1bf   :  { %1811 = vtanh.f32 %v206_v23 }
 0x1c9   :  { %v1981_v25 = vpop.eup %1811 }
 0x1ca   :  { %292 = vrot.lane.b32.xlu0 %v1981_v25, %s1850_s17 }
 0x22f   :  { %v286_v26 = vpop.f32.mrb[2].mxu0 }
 0x230   :  { %v287_v27 = vadd.f32 %v1951_v12, %v286_v26  ;;  %v1597_v28 = vpop.f32.mrb[3].mxu0 }
 0x232   :  { %1813 = vtanh.f32 %v287_v27 }
 0x23c   :  { %v1814_v29 = vpop.eup %1813  ;;  %v293_v30 = vpop.permute.xlu0 %292 }
 0x23d   :  { %v295_v31 = vsel %vm123_vm7, %v1814_v29, %v293_v30  ;;  %373 = vrot.lane.b32.xlu1 %v1814_v29, %s1849_s3  ;;  %v1495_v29 = vld [vmem:[%s2184_s0 + $0xc] sm:$0x3] }
 0x23e   :  { %1605 = vmatmul.mubr.msk.f32.vlgmr.msra.gmra.mrb[2].mxu1 %vm131_vm8, %v295_v31 }
 0x23f   :  { %1746 = vmatpush3.bf16.msra.mxu1 %v1936_v10  ;;  %1620 = vmatprep.mubr.msk.f32.mxu1 %vm1847_vm4, %v1848_v5 }
 0x240   :  { %1618 = vmatprep.subr.mxu1 %v1848_v5 }
 0x243   :  { %1619 = vmatpush3.msk.msra.mxu1 %vm135_vm6, %v1943_v11 }
 0x244   :  { %1747 = vmatprep.subr.bf16.mxu1 %v1845_v0 }
 0x2af   :  { %v374_v33 = vpop.permute.xlu1 %373 }
 0x2b0   :  { %v376_v34 = vsel %vm36_vm3, %v1475_v32, %v374_v33 }
 0x2b1   :  { %1612 = vmatmul.mubr.msk.f32.vlgmr.msra.gmra.mrb[4].mxu0 %vm44_vm5, %v376_v34 }
 0x2b2   :  { %1757 = vmatpush3.bf16.msk.msra.mxu0 %vm1904_vm2, %v1909_v4  ;;  %1643 = vmatprep.mubr.msk.f32.mxu0 %vm1847_vm4, %v1848_v5 }
 0x2b3   :  { %1758 = vmatprep.subr.bf16.mxu0 %v1845_v0 }
 0x311   :  { %v365_v35 = vpop.f32.mrb[2].mxu1 }
 0x312   :  { %v366_v36 = vadd.f32 %v1978_v21, %v365_v35  ;;  %v1606_v37 = vpop.f32.mrb[3].mxu1 }
 0x314   :  { %1815 = vtanh.f32 %v366_v36 }
 0x31e   :  { %v1816_v38 = vpop.eup %1815 }
 0x31f   :  { %452 = vrot.lane.b32.xlu1 %v1816_v38, %s1850_s17 }
 0x384   :  { %v446_v39 = vpop.f32.mrb[4].mxu0 }
 0x385   :  { %v447_v40 = vadd.f32 %v1951_v12, %v446_v39  ;;  %v1613_v41 = vpop.f32.mrb[5].mxu0 }
 0x387   :  { %1817 = vtanh.f32 %v447_v40  ;;  %v1500_v40 = vld [vmem:[%s2184_s0 + $0xe] sm:$0x3]  ;;  %s1853_s0 = smov 60  }
 0x391   :  { %v1818_v42 = vpop.eup %1817  ;;  %v2010_v43 = vpop.permute.xlu1 %452 }
 0x392   :  { %v455_v44 = vsel %vm123_vm7, %v1818_v42, %v2010_v43  ;;  %533 = vrot.lane.b32.xlu0 %v1818_v42, %s1849_s3 }
 0x393   :  { %1621 = vmatmul.mubr.msk.f32.vlgmr.msra.gmra.mrb[4].mxu1 %vm131_vm8, %v455_v44 }
 0x394   :  { %1750 = vmatpush3.bf16.msk.msra.mxu1 %vm1904_vm2, %v1909_v4  ;;  %1627 = vmatprep.mubr.msk.f32.mxu1 %vm1847_vm4, %v1848_v5 }
 0x395   :  { %1751 = vmatprep.subr.bf16.mxu1 %v1845_v0 }
 0x404   :  { %v534_v46 = vpop.permute.xlu0 %533 }
 0x405   :  { %v536_v47 = vsel %vm36_vm3, %v1480_v45, %v534_v46 }
 0x406   :  { %1628 = vmatmul.mubr.msk.f32.vlgmr.msra.gmra.mrb[6].mxu1 %vm44_vm5, %v536_v47 }
 0x407   :  { %1753 = vmatpush3.bf16.msra.mxu1 %v1936_v10  ;;  %1636 = vmatprep.mubr.msk.f32.mxu1 %vm1847_vm4, %v1848_v5 }
 0x408   :  { %1634 = vmatprep.subr.mxu1 %v1848_v5 }
 0x40b   :  { %1635 = vmatpush3.msk.msra.mxu1 %vm135_vm6, %v1943_v11 }
 0x40c   :  { %1761 = vmatprep.subr.bf16.mxu1 %v1845_v0 }
 0x466   :  { %v525_v48 = vpop.f32.mrb[4].mxu1 }
 0x467   :  { %v526_v49 = vadd.f32 %v1978_v21, %v525_v48  ;;  %v1622_v50 = vpop.f32.mrb[5].mxu1 }
 0x469   :  { %1819 = vtanh.f32 %v526_v49 }
 0x473   :  { %v2035_v51 = vpop.eup %1819 }
 0x474   :  { %612 = vrot.lane.b32.xlu1 %v2035_v51, %s1850_s17 }
 0x4d9   :  { %v606_v52 = vpop.f32.mrb[6].mxu1 }
 0x4da   :  { %v607_v53 = vadd.f32 %v1951_v12, %v606_v52  ;;  %v1629_v54 = vpop.f32.mrb[7].mxu1  ;;  %v1362_v52 = vld [vmem:[%s2188_s5 + $0x8] sm:$0xff] }
 0x4db   :  { %v1364_v54 = vld [vmem:[%s2188_s5 + $0x18] sm:$0xff] }
 0x4dc   :  { %1821 = vtanh.f32 %v607_v53 }
 0x4e6   :  { %v1822_v55 = vpop.eup %1821  ;;  %v613_v56 = vpop.permute.xlu1 %612 }
 0x4e7   :  { %v615_v57 = vsel %vm123_vm7, %v1822_v55, %v613_v56  ;;  %693 = vrot.lane.b32.xlu0 %v1822_v55, %s1849_s3  ;;  %v1365_v56 = vld [vmem:[%s2188_s5 + $0x20] sm:$0xff] }
 0x4e8   :  { %1637 = vmatmul.mubr.msk.f32.vlgmr.msra.gmra.mrb[8].mxu1 %vm131_vm8, %v615_v57  ;;  %v1366_v57 = vld [vmem:[%s2188_s5 + $0x28] sm:$0xff] }
 0x4e9   :  { %1764 = vmatpush3.bf16.msk.msra.mxu1 %vm1904_vm2, %v1909_v4  ;;  %1659 = vmatprep.mubr.msk.f32.mxu1 %vm1847_vm4, %v1848_v5 }
 0x4ea   :  { %1765 = vmatprep.subr.bf16.mxu1 %v1845_v0 }
 0x559   :  { %v694_v59 = vpop.permute.xlu0 %693 }
 0x55a   :  { %v696_v60 = vsel %vm36_vm3, %v1485_v58, %v694_v59  ;;  %v1789_v58 = vpack.c.bf16 %v1366_v57, %v1365_v56  ;;  %v1367_v59 = vld [vmem:[%s2188_s5 + $0x30] sm:$0xff] }
 0x55b   :  { %1644 = vmatmul.mubr.msk.f32.vlgmr.msra.gmra.mrb[6].mxu0 %vm44_vm5, %v696_v60  ;;  %v1368_v60 = vld [vmem:[%s2188_s5 + $0x38] sm:$0xff] }
 0x55c   :  { %1760 = vmatpush3.bf16.msra.mxu0 %v1936_v10  ;;  %1652 = vmatprep.mubr.msk.f32.mxu0 %vm1847_vm4, %v1848_v5 }
 0x55d   :  { %1650 = vmatprep.subr.mxu0 %v1848_v5 }
 0x560   :  { %1651 = vmatpush3.msk.msra.mxu0 %vm135_vm6, %v1943_v11 }
 0x561   :  { %1768 = vmatprep.subr.bf16.mxu0 %v1845_v0 }
 0x5bb   :  { %v685_v61 = vpop.f32.mrb[8].mxu1 }
 0x5bc   :  { %v686_v62 = vadd.f32 %v1978_v21, %v685_v61  ;;  %v1638_v63 = vpop.f32.mrb[9].mxu1  ;;  %v1792_v61 = vpack.c.bf16 %v1368_v60, %v1367_v59 }
 0x5bd   :  { %v1370_v63 = vld [vmem:[%s2188_s5 + $0x48] sm:$0xff] }
 0x5be   :  { %1823 = vtanh.f32 %v686_v62  ;;  %v1369_v62 = vld [vmem:[%s2188_s5 + $0x40] sm:$0xff] }
 0x5c8   :  { %v2062_v1 = vpop.eup %1823 }
 0x5c9   :  { %772 = vrot.lane.b32.xlu1 %v2062_v1, %s1850_s17 }
 0x62e   :  { %v766_v2 = vpop.f32.mrb[6].mxu0 }
 0x62f   :  { %v767_v6 = vadd.f32 %v1951_v12, %v766_v2  ;;  %v1645_v7 = vpop.f32.mrb[7].mxu0 }
 0x631   :  { %1825 = vtanh.f32 %v767_v6 }
 0x63b   :  { %v1826_v8 = vpop.eup %1825  ;;  %v773_v9 = vpop.permute.xlu1 %772 }
 0x63c   :  { %v775_v13 = vsel %vm123_vm7, %v1826_v8, %v773_v9  ;;  %853 = vrot.lane.b32.xlu0 %v1826_v8, %s1849_s3  ;;  %v12_v8 = vstv %s2189_s6 }
 0x63d   :  { %1653 = vmatmul.mubr.msk.f32.vlgmr.msra.gmra.mrb[8].mxu0 %vm131_vm8, %v775_v13  ;;  %13 = vst [vmem:[#allocation2] sm:$0x1] %v12_v8 }
 0x63e   :  { %1771 = vmatpush3.bf16.msk.msra.mxu0 %vm1904_vm2, %v1909_v4  ;;  %1675 = vmatprep.mubr.msk.f32.mxu0 %vm1847_vm4, %v1848_v5 }
 0x63f   :  { %1772 = vmatprep.subr.bf16.mxu0 %v1845_v0 }
 0x6ae   :  { %v854_v15 = vpop.permute.xlu0 %853 }
 0x6af   :  { %v856_v16 = vsel %vm36_vm3, %v1490_v14, %v854_v15 }
 0x6b0   :  { %1660 = vmatmul.mubr.msk.f32.vlgmr.msra.gmra.mrb[10].mxu1 %vm44_vm5, %v856_v16 }
 0x6b1   :  { %1767 = vmatpush3.bf16.msra.mxu1 %v1936_v10  ;;  %1668 = vmatprep.mubr.msk.f32.mxu1 %vm1847_vm4, %v1848_v5 }
 0x6b2   :  { %1666 = vmatprep.subr.mxu1 %v1848_v5 }
 0x6b5   :  { %1667 = vmatpush3.msk.msra.mxu1 %vm135_vm6, %v1943_v11 }
 0x6b6   :  { %1775 = vmatprep.subr.bf16.mxu1 %v1845_v0 }
 0x710   :  { %v845_v17 = vpop.f32.mrb[8].mxu0 }
 0x711   :  { %v846_v18 = vadd.f32 %v1978_v21, %v845_v17  ;;  %v1654_v19 = vpop.f32.mrb[9].mxu0 }
 0x713   :  { %1827 = vtanh.f32 %v846_v18 }
 0x71d   :  { %v1828_v20 = vpop.eup %1827 }
 0x71e   :  { %932 = vrot.lane.b32.xlu1 %v1828_v20, %s1850_s17 }
 0x783   :  { %v926_v22 = vpop.f32.mrb[10].mxu1 }
 0x784   :  { %v927_v23 = vadd.f32 %v1951_v12, %v926_v22  ;;  %v1661_v24 = vpop.f32.mrb[11].mxu1 }
 0x786   :  { %1829 = vtanh.f32 %v927_v23 }
 0x790   :  { %v1830_v26 = vpop.eup %1829  ;;  %v933_v27 = vpop.permute.xlu1 %932 }
 0x791   :  { %v935_v28 = vsel %vm123_vm7, %v1830_v26, %v933_v27  ;;  %1013 = vrot.lane.b32.xlu0 %v1830_v26, %s1849_s3  ;;  %v1505_v26 = vld [vmem:[#allocation2] ss:$0 sm:$0xff] }
 0x792   :  { %1669 = vmatmul.mubr.msk.f32.vlgmr.msra.gmra.mrb[12].mxu1 %vm131_vm8, %v935_v28 }
 0x793   :  { %1778 = vmatpush3.bf16.msk.msra.mxu1 %vm1904_vm2, %v1909_v4  ;;  %1691 = vmatprep.mubr.msk.f32.mxu1 %vm1847_vm4, %v1848_v5 }
 0x794   :  { %1779 = vmatprep.subr.bf16.mxu1 %v1845_v0 }
 0x803   :  { %v1014_v30 = vpop.permute.xlu0 %1013 }
 0x804   :  { %v1016_v31 = vsel %vm36_vm3, %v1495_v29, %v1014_v30 }
 0x805   :  { %1676 = vmatmul.mubr.msk.f32.vlgmr.msra.gmra.mrb[10].mxu0 %vm44_vm5, %v1016_v31 }
 0x806   :  { %1774 = vmatpush3.bf16.msra.mxu0 %v1936_v10  ;;  %1684 = vmatprep.mubr.msk.f32.mxu0 %vm1847_vm4, %v1848_v5 }
 0x807   :  { %1682 = vmatprep.subr.mxu0 %v1848_v5 }
 0x80a   :  { %1683 = vmatpush3.msk.msra.mxu0 %vm135_vm6, %v1943_v11 }
 0x80b   :  { %1782 = vmatprep.subr.bf16.mxu0 %v1845_v0 }
 0x865   :  { %v1005_v3 = vpop.f32.mrb[12].mxu1 }
 0x866   :  { %v1006_v4 = vadd.f32 %v1978_v21, %v1005_v3  ;;  %v1670_v32 = vpop.f32.mrb[13].mxu1 }
 0x868   :  { %1831 = vtanh.f32 %v1006_v4 }
 0x872   :  { %v1832_v33 = vpop.eup %1831 }
 0x873   :  { %1092 = vrot.lane.b32.xlu1 %v1832_v33, %s1850_s17 }
 0x8d8   :  { %v1086_v34 = vpop.f32.mrb[10].mxu0 }
 0x8d9   :  { %v1087_v35 = vadd.f32 %v1951_v12, %v1086_v34  ;;  %v1677_v36 = vpop.f32.mrb[11].mxu0 }
 0x8db   :  { %1833 = vtanh.f32 %v1087_v35 }
 0x8e5   :  { %v1834_v37 = vpop.eup %1833  ;;  %v1093_v38 = vpop.permute.xlu1 %1092 }
 0x8e6   :  { %v1095_v39 = vsel %vm123_vm7, %v1834_v37, %v1093_v38  ;;  %1173 = vrot.lane.b32.xlu0 %v1834_v37, %s1849_s3 }
 0x8e7   :  { %1685 = vmatmul.mubr.msk.f32.vlgmr.msra.gmra.mrb[12].mxu0 %vm131_vm8, %v1095_v39 }
 0x8e8   :  { %1723 = vmatprep.mubr.msk.f32.mxu0 %vm1847_vm4, %v1848_v5 }
 0x8ea   :  { %1330 = vrot.lane.b32.xlu0 %v2035_v51, %s1851_s27  ;;  %v1361_v51 = vld [vmem:[%s2188_s5] sm:$0xff] }
 0x8eb   :  { %v1783_v53 = vpack.c.bf16 %v1362_v52, %v1361_v51 }
 0x8ed   :  { %1784 = vmatpush3.bf16.msra.mxu0 %v1783_v53 }
 0x8ee   :  { %1336 = vrot.lane.b32.xlu0 %v1828_v20, %s1852_s28  ;;  %1785 = vmatprep.subr.bf16.mxu0 %v1845_v0  ;;  %s1856_s28 = smov 70  }
 0x958   :  { %v1174_v41 = vpop.permute.xlu0 %1173 }
 0x959   :  { %v1176_v42 = vsel %vm36_vm3, %v1500_v40, %v1174_v41 }
 0x95a   :  { %1692 = vmatmul.mubr.msk.f32.vlgmr.msra.gmra.mrb[14].mxu1 %vm44_vm5, %v1176_v42 }
 0x95b   :  { %1781 = vmatpush3.bf16.msra.mxu1 %v1936_v10  ;;  %1700 = vmatprep.mubr.msk.f32.mxu1 %vm1847_vm4, %v1848_v5 }
 0x95c   :  { %1698 = vmatprep.subr.mxu1 %v1848_v5  ;;  %v1331_v14 = vpop.permute.xlu0 %1330 }
 0x95f   :  { %1699 = vmatpush3.msk.msra.mxu1 %vm135_vm6, %v1943_v11 }
 0x960   :  { %v1337_v17 = vpop.permute.xlu0 %1336 }
 0x9ba   :  { %v1165_v44 = vpop.f32.mrb[12].mxu0 }
 0x9bb   :  { %v1166_v45 = vadd.f32 %v1978_v21, %v1165_v44  ;;  %v1686_v46 = vpop.f32.mrb[13].mxu0 }
 0x9bd   :  { %1835 = vtanh.f32 %v1166_v45 }
 0x9c7   :  { %v1836_v47 = vpop.eup %1835 }
 0x9c8   :  { %1342 = vrot.lane.b32.xlu0 %v1836_v47, %s1853_s0  ;;  %1252 = vrot.lane.b32.xlu1 %v1836_v47, %s1850_s17 }
 0x9cc   :  { %1333 = vrot.lane.b32.xlu1 %v2062_v1, %s1854_s30  ;;  %v1795_v1 = vpack.c.bf16 %v1370_v63, %v1369_v62 }
 0x9d0   :  { %1339 = vrot.lane.b32.xlu1 %v1832_v33, %s1855_s8 }
 0xa2d   :  { %v1246_v10 = vpop.f32.mrb[14].mxu1 }
 0xa2e   :  { %v1247_v5 = vadd.f32 %v1951_v12, %v1246_v10  ;;  %v1693_v48 = vpop.f32.mrb[15].mxu1  ;;  %v1363_v12 = vld [vmem:[%s2188_s5 + $0x10] sm:$0xff] }
 0xa2f   :  { %v1786_v55 = vpack.c.bf16 %v1364_v54, %v1363_v12 }
 0xa30   :  { %1837 = vtanh.f32 %v1247_v5 }
 0xa31   :  { %1787 = vmatpush3.bf16.msra.mxu0 %v1786_v55 }
 0xa32   :  { %1788 = vmatprep.subr.bf16.mxu0 %v1845_v0 }
 0xa35   :  { %1790 = vmatpush3.bf16.msra.mxu0 %v1789_v58 }
 0xa36   :  { %1791 = vmatprep.subr.bf16.mxu0 %v1845_v0 }
 0xa39   :  { %1793 = vmatpush3.bf16.msra.mxu0 %v1792_v61 }
 0xa3a   :  { %v1838_v11 = vpop.eup %1837  ;;  %v1253_v49 = vpop.permute.xlu1 %1252  ;;  %1794 = vmatprep.subr.bf16.mxu0 %v1845_v0  ;;  %v1349_v0 = vsel %vm123_vm7, %v1981_v25, %v2010_v43 }
 0xa3b   :  { %v1255_v50 = vsel %vm123_vm7, %v1838_v11, %v1253_v49  ;;  %v1350_v15 = vsel %vm131_vm8, %v1349_v0, %v1331_v14  ;;  %v1343_v20 = vpop.permute.xlu0 %1342 }
 0xa3c   :  { %1701 = vmatmul.mubr.msk.f32.vlgmr.msra.gmra.mrb[16].mxu1 %vm131_vm8, %v1255_v50 }
 0xa3d   :  { %1796 = vmatpush3.bf16.msra.mxu0 %v1795_v1 }
 0xa3e   :  { %v1334_v13 = vpop.permute.xlu1 %1333 }
 0xa42   :  { %v1340_v16 = vpop.permute.xlu1 %1339 }
 0xb0f   :  { %v1325_v2 = vpop.f32.mrb[16].mxu1 }
 0xb10   :  { %v1326_v6 = vadd.f32 %v1978_v21, %v1325_v2  ;;  %v1702_v7 = vpop.f32.mrb[17].mxu1  ;;  %v1352_v21 = vsel %vm1351_vm9, %v1350_v15, %v1334_v13 }
 0xb11   :  { %v1354_v18 = vsel %vm1353_vm10, %v1352_v21, %v1337_v17 }
 0xb12   :  { %1839 = vtanh.f32 %v1326_v6  ;;  %v1356_v19 = vsel %vm1355_vm11, %v1354_v18, %v1340_v16 }
 0xb13   :  { %v1358_v22 = vsel %vm1357_vm12, %v1356_v19, %v1343_v20 }
 0xb1c   :  { %v1840_v9 = vpop.eup %1839 }
 0xb1d   :  { %1346 = vrot.lane.b32.xlu1 %v1840_v9, %s1856_s28 }
 0xb8f   :  { %v1347_v23 = vpop.permute.xlu1 %1346 }
 0xb90   :  { %v1360_v24 = vsel %vm1359_vm13, %v1358_v22, %v1347_v23 }
 0xb91   :  { %1724 = vmatmul.mubr.msk.f32.vlgmr.msra.gmra.mrb[14].mxu0 %vm1378_vm14, %v1360_v24 }
 0xc64   :  { %v1448_v27 = vpop.f32.mrb[14].mxu0 }
 0xc65   :  { %v1449_v25 = vadd.f32 %v1505_v26, %v1448_v27  ;;  %v1725_v43 = vpop.f32.mrb[15].mxu0 }
 0xc67   :  { %v1507_v28 = vmul.f32 -1.442695, %v1449_v25 }
 0xc69   :  { %1841 = vpow2.f32 %v1507_v28 }
 0xc73   :  { %v1842_v29 = vpop.eup %1841 }
 0xc74   :  { %v1455_v30 = vadd.f32 1.0, %v1842_v29 }
 0xc76   :  { %1843 = vrcp.f32 %v1455_v30 }
 0xc80   :  { %v1844_v31 = vpop.eup %1843 }
 0xc81   :  { %1459 = vst.msk [vmem:[%s2190_s7] sm:$0x3] %vm1458_vm15, %v1844_v31 }

</bundles_post_ra>
